<compile_context>
chip_gen: v5e
topology: v5e:2x2
jax: 0.10.0
libtpu: 0.0.40
codegen_flags: <defaults>
</compile_context>

<pallas_src>
import jax
import jax.numpy as jnp
from jax.experimental import pallas as pl
from jax.experimental.pallas import tpu as pltpu


# ---------------------------------------------------------------------------
# Fused kernel: feature transform + STJGC stand-in + all horizon heads
# ---------------------------------------------------------------------------
def _mte_stjgc_fused_kernel(
    x_ref,    # (Bt, N, C)   last-timestep input, feature-last
    a_ref,    # (Bt, N, N)   per-sample MTE / predefined adjacency
    ftw_ref,  # (C, D)       1x1-conv weight, transposed (torch W.squeeze().T)
    ftb_ref,  # (1, D)       1x1-conv bias
    m_ref,    # (D, D)       multi_interaction
    w1_ref,   # (D, H*D)     all heads' Linear1 weights (W1.T) stacked on out dim
    b1_ref,   # (1, H*D)
    w2_ref,   # (H*D, H)     block-diagonal Linear2 weights (one column / head)
    b2_ref,   # (1, H)
    o_ref,    # (Bt, N, H)
):
    x = x_ref[...]                                 # (Bt, N, C)
    ftw = ftw_ref[...]                             # (C, D)
    ftb = ftb_ref[...].reshape(1, 1, -1)           # (1, 1, D)

    # --- 1x1 conv feature transform (folded in) ----------------------------
    if x.shape[-1] == 1:
        # K=1 contraction: VPU broadcast-multiply instead of a degenerate MXU dot.
        emb = x * ftw.reshape(1, 1, -1) + ftb      # (Bt, N, D)
    else:
        emb = jnp.einsum("bnc,cd->bnd", x, ftw,
                         preferred_element_type=jnp.float32) + ftb

    # --- STJGC stand-in: relu((A_b @ X_b) @ M), shared @M hoisted ------------
    # TODO(synk): real DilatedSpatioTemporalGCN semantics unavailable (see header).
    ax = jnp.einsum("bij,bjd->bid", a_ref[...], emb,
                    preferred_element_type=jnp.float32)        # (Bt, N, D)
    h = jnp.maximum(
        jnp.einsum("bnd,de->bne", ax, m_ref[...],
                   preferred_element_type=jnp.float32), 0.0)   # (Bt, N, D)

    # --- all horizon heads at once: Linear -> ReLU -> Linear -----------------
    z = jnp.maximum(
        jnp.einsum("bnd,dk->bnk", h, w1_ref[...],
                   preferred_element_type=jnp.float32)
        + b1_ref[...].reshape(1, 1, -1), 0.0)                  # (Bt, N, H*D)
    y = (jnp.einsum("bnk,kh->bnh", z, w2_ref[...],
                    preferred_element_type=jnp.float32)
         + b2_ref[...].reshape(1, 1, -1))                      # (Bt, N, H)
    o_ref[...] = y


def fused_forward(x_last, adj, ftw_t, ftb, m, w1s, b1s, w2blk, b2row,
                  *, batch_block=8):
    """x_last:(B,N,C), adj:(B,N,N) -> (B, N, H)."""
    B, N, C = x_last.shape
    D = m.shape[0]
    HD = w1s.shape[1]
    H = w2blk.shape[1]

    Bt = min(batch_block, B)
    Bp = pl.cdiv(B, Bt) * Bt
    if Bp != B:  # pad batch so the grid tiles evenly; padded rows sliced off below
        x_last = jnp.pad(x_last, ((0, Bp - B), (0, 0), (0, 0)))
        adj = jnp.pad(adj, ((0, Bp - B), (0, 0), (0, 0)))

    const2 = lambda b: (0, 0)
    out = pl.pallas_call(
        _mte_stjgc_fused_kernel,
        out_shape=jax.ShapeDtypeStruct((Bp, N, H), jnp.float32),
        grid=(Bp // Bt,),
        in_specs=[
            pl.BlockSpec((Bt, N, C), lambda b: (b, 0, 0)),
            pl.BlockSpec((Bt, N, N), lambda b: (b, 0, 0)),
            pl.BlockSpec((C, D), const2),    # constant index_maps: weights are
            pl.BlockSpec((1, D), const2),    # DMA'd once and stay VMEM-resident
            pl.BlockSpec((D, D), const2),
            pl.BlockSpec((D, HD), const2),
            pl.BlockSpec((1, HD), const2),
            pl.BlockSpec((HD, H), const2),
            pl.BlockSpec((1, H), const2),
        ],
        out_specs=pl.BlockSpec((Bt, N, H), lambda b: (b, 0, 0)),
        compiler_params=pltpu.CompilerParams(
            # batch blocks are independent with disjoint outputs -> shardable
            # across v7x's 2 TensorCores; harmless on v5e/v6e.
            dimension_semantics=("parallel",),
        ),
    )(x_last, adj, ftw_t, ftb.reshape(1, D), m, w1s, b1s, w2blk, b2row)
    return out[:B]


# ---------------------------------------------------------------------------
# Parameter packing (JAX glue, done once)
# ---------------------------------------------------------------------------
def pack_head_params(w1t_all, b1_all, w2_all, b2_all):
    """Stack per-head Linear weights so all horizons run in one pair of matmuls."""
    H, D, _ = w1t_all.shape
    w1_stacked = jnp.transpose(w1t_all, (1, 0, 2)).reshape(D, H * D)   # (D, H*D)
    b1_stacked = b1_all.reshape(1, H * D)                              # (1, H*D)
    eye = jnp.eye(H, dtype=w2_all.dtype)
    # block-diagonal: row h*D+d, column h holds w2[h, d]
    w2_blockdiag = (w2_all[:, :, 0][:, :, None] * eye[:, None, :]).reshape(H * D, H)
    b2_row = b2_all.reshape(1, H)                                      # (1, H)
    return w1_stacked, b1_stacked, w2_blockdiag, b2_row


# ---------------------------------------------------------------------------
# Full forward (mirrors MTE_STJGC.forward on the implemented code path)
# ---------------------------------------------------------------------------
def mte_stjgc_forward(params, x, index_of_MTE_matrices, idx_count, is_training):
    del idx_count, is_training  # not used on this code path
    B, T, C, N = x.shape
    x = x.astype(jnp.float32)

    lo, hi = index_of_MTE_matrices
    assert hi - lo == B, "adjacency slice must match the batch size"
    mte = params["adj"][lo:hi]                        # (B, N, N)

    # Only the last timestep is consumed by the stand-in, so the 1x1-conv
    # feature transform is restricted to that slice and folded into the kernel.
    x_last = jnp.transpose(x[:, -1], (0, 2, 1))       # (B, N, C)

    w1s, b1s, w2blk, b2row = pack_head_params(
        params["w1t"], params["b1"], params["w2"], params["b2"])

    out = fused_forward(
        x_last, mte,
        params["ft_w"].T,                             # (C, D)
        params["ft_b"],
        params["multi_interaction"],
        w1s, b1s, w2blk, b2row,
    )                                                 # (B, N, horizon)
    return out[..., None]                             # (B, N, horizon, 1)


# ---------------------------------------------------------------------------
# Pure-JAX reference (torch-style math, per-head loop) for a sanity check
# ---------------------------------------------------------------------------
def reference_forward(params, x, index_of_MTE_matrices):
    B, T, C, N = x.shape
    lo, hi = index_of_MTE_matrices
    mte = params["adj"][lo:hi]
    x_last = jnp.transpose(x[:, -1], (0, 2, 1))                       # (B, N, C)
    emb = x_last @ params["ft_w"].T + params["ft_b"]                  # (B, N, D)
    h = jax.nn.relu(
        jnp.einsum("bij,bjd,de->bie", mte, emb, params["multi_interaction"]))
    outs = []
    for hd in range(params["w1t"].shape[0]):
        z = jax.nn.relu(h @ params["w1t"][hd] + params["b1"][hd])     # (B, N, D)
        outs.append(z @ params["w2"][hd] + params["b2"][hd])          # (B, N, 1)
    return jnp.stack(outs, axis=2)                                    # (B, N, H, 1)


def init_params(key, *, in_dim, node_dim, num_nodes, horizon, num_mte_mats):
    ks = jax.random.split(key, 8)
    scale = 0.1
    return {
        "ft_w": scale * jax.random.normal(ks[0], (node_dim, in_dim), jnp.float32),
        "ft_b": scale * jax.random.normal(ks[1], (node_dim,), jnp.float32),
        "multi_interaction": scale
        * jax.random.normal(ks[2], (node_dim, node_dim), jnp.float32),
        "adj": jax.nn.softmax(
            jax.random.normal(ks[3], (num_mte_mats, num_nodes, num_nodes),
                              jnp.float32), axis=-1),
        # torch nn.Linear: y = x @ W.T + b ; W.T stored directly
        "w1t": scale
        * jax.random.normal(ks[4], (horizon, node_dim, node_dim), jnp.float32),
        "b1": scale * jax.random.normal(ks[5], (horizon, 1, node_dim), jnp.float32),
        "w2": scale * jax.random.normal(ks[6], (horizon, node_dim, 1), jnp.float32),
        "b2": scale * jax.random.normal(ks[7], (horizon, 1, 1), jnp.float32),
    }


if __name__ == "__main__":
    # small shapes consistent with the module's forward
    B, T, in_dim, N = 2, 8, 1, 16     # batch, seq_length, in_dim, num_nodes
    node_dim, horizon = 16, 4
    num_mte_mats = 6

    key = jax.random.PRNGKey(0)
    kp, kx = jax.random.split(key)
    params = init_params(
        kp, in_dim=in_dim, node_dim=node_dim, num_nodes=N,
        horizon=horizon, num_mte_mats=num_mte_mats)
    x = jax.random.normal(kx, (B, T, in_dim, N), jnp.float32)

    out = mte_stjgc_forward(params, x, (0, B), idx_count=0, is_training=False)
    out = jax.block_until_ready(out)
    assert out.shape == (B, N, horizon, 1), out.shape
    assert bool(jnp.all(jnp.isfinite(out)))

    with jax.default_matmul_precision("highest"):
        ref = reference_forward(params, x.astype(jnp.float32), (0, B))
    err = float(jnp.max(jnp.abs(out - ref)))
    assert err < 1e-2, f"mismatch vs reference: max abs err {err}"

    print("KERNEL_OK")
</pallas_src>

<mosaic_0001>
module attributes {stable_mosaic.version = 11 : i64} {
  func.func @_mte_stjgc_fused_kernel(%arg0: i32, %arg1: memref<2x16x1xf32, #tpu.memory_space<vmem>>, %arg2: memref<2x16x16xf32, #tpu.memory_space<vmem>>, %arg3: memref<1x16xf32, #tpu.memory_space<vmem>>, %arg4: memref<1x16xf32, #tpu.memory_space<vmem>>, %arg5: memref<16x16xf32, #tpu.memory_space<vmem>>, %arg6: memref<16x64xf32, #tpu.memory_space<vmem>>, %arg7: memref<1x64xf32, #tpu.memory_space<vmem>>, %arg8: memref<64x4xf32, #tpu.memory_space<vmem>>, %arg9: memref<1x4xf32, #tpu.memory_space<vmem>>, %arg10: memref<2x16x4xf32, #tpu.memory_space<vmem>>) attributes {dimension_semantics = [#tpu.dimension_semantics<parallel>], iteration_bounds = array<i64: 1>, scalar_prefetch = 0 : i64, scratch_operands = 0 : i64, tpu.core_type = #tpu.core_type<tc>, window_params = [{transform_indices = @transform_0, window_bounds = array<i64: 2, 16, 1>}, {transform_indices = @transform_1, window_bounds = array<i64: 2, 16, 16>}, {pipeline_mode = #tpu.pipeline_mode<synchronous>, transform_indices = @transform_2, window_bounds = array<i64: 1, 16>}, {pipeline_mode = #tpu.pipeline_mode<synchronous>, transform_indices = @transform_3, window_bounds = array<i64: 1, 16>}, {pipeline_mode = #tpu.pipeline_mode<synchronous>, transform_indices = @transform_4, window_bounds = array<i64: 16, 16>}, {pipeline_mode = #tpu.pipeline_mode<synchronous>, transform_indices = @transform_5, window_bounds = array<i64: 16, 64>}, {pipeline_mode = #tpu.pipeline_mode<synchronous>, transform_indices = @transform_6, window_bounds = array<i64: 1, 64>}, {pipeline_mode = #tpu.pipeline_mode<synchronous>, transform_indices = @transform_7, window_bounds = array<i64: 64, 4>}, {pipeline_mode = #tpu.pipeline_mode<synchronous>, transform_indices = @transform_8, window_bounds = array<i64: 1, 4>}, {transform_indices = @transform_9, window_bounds = array<i64: 2, 16, 4>}]} {
    %c0 = arith.constant 0 : index
    %c0_0 = arith.constant 0 : index
    %c0_1 = arith.constant 0 : index
    %0 = vector.load %arg1[%c0, %c0_0, %c0_1] : memref<2x16x1xf32, #tpu.memory_space<vmem>>, vector<2x16x1xf32>
    %c0_2 = arith.constant 0 : index
    %c0_3 = arith.constant 0 : index
    %1 = vector.load %arg3[%c0_2, %c0_3] : memref<1x16xf32, #tpu.memory_space<vmem>>, vector<1x16xf32>
    %c0_4 = arith.constant 0 : index
    %c0_5 = arith.constant 0 : index
    %2 = vector.load %arg4[%c0_4, %c0_5] : memref<1x16xf32, #tpu.memory_space<vmem>>, vector<1x16xf32>
    %3 = vector.shape_cast %2 : vector<1x16xf32> to vector<1x1x16xf32>
    %4 = vector.shape_cast %1 : vector<1x16xf32> to vector<1x1x16xf32>
    %5 = vector.broadcast %0 : vector<2x16x1xf32> to vector<2x16x16xf32>
    %6 = vector.broadcast %4 : vector<1x1x16xf32> to vector<2x16x16xf32>
    %7 = arith.mulf %5, %6 : vector<2x16x16xf32>
    %8 = vector.broadcast %3 : vector<1x1x16xf32> to vector<2x16x16xf32>
    %9 = arith.addf %7, %8 : vector<2x16x16xf32>
    %c0_6 = arith.constant 0 : index
    %c0_7 = arith.constant 0 : index
    %c0_8 = arith.constant 0 : index
    %10 = vector.load %arg2[%c0_6, %c0_7, %c0_8] : memref<2x16x16xf32, #tpu.memory_space<vmem>>, vector<2x16x16xf32>
    "tpu.trace_start"() <{level = 10 : i32, message = "bij,bjd->bid"}> : () -> ()
    %cst = arith.constant dense<0.000000e+00> : vector<2x16x16xf32>
    %11 = tpu.matmul %10, %9, %cst {dimension_numbers = #tpu.dot_dimension_numbers<[2], [1], [1], [2], [0, 0, 0, 1, 1, 2], [0], [0]>} : vector<2x16x16xf32>, vector<2x16x16xf32>, vector<2x16x16xf32> -> vector<2x16x16xf32>
    "tpu.trace_stop"() : () -> ()
    %c0_9 = arith.constant 0 : index
    %c0_10 = arith.constant 0 : index
    %12 = vector.load %arg5[%c0_9, %c0_10] : memref<16x16xf32, #tpu.memory_space<vmem>>, vector<16x16xf32>
    "tpu.trace_start"() <{level = 10 : i32, message = "bnd,de->bne"}> : () -> ()
    %cst_11 = arith.constant dense<0.000000e+00> : vector<2x16x16xf32>
    %13 = tpu.matmul %11, %12, %cst_11 {dimension_numbers = #tpu.dot_dimension_numbers<[2], [0], [0, 1], [1], [0, 0, 0, 1, 1, 1], [], []>} : vector<2x16x16xf32>, vector<16x16xf32>, vector<2x16x16xf32> -> vector<2x16x16xf32>
    "tpu.trace_stop"() : () -> ()
    %cst_12 = arith.constant 0.000000e+00 : f32
    %14 = vector.broadcast %cst_12 : f32 to vector<2x16x16xf32>
    %15 = arith.maximumf %13, %14 : vector<2x16x16xf32>
    %c0_13 = arith.constant 0 : index
    %c0_14 = arith.constant 0 : index
    %16 = vector.load %arg6[%c0_13, %c0_14] : memref<16x64xf32, #tpu.memory_space<vmem>>, vector<16x64xf32>
    "tpu.trace_start"() <{level = 10 : i32, message = "bnd,dk->bnk"}> : () -> ()
    %cst_15 = arith.constant dense<0.000000e+00> : vector<2x16x64xf32>
    %17 = tpu.matmul %15, %16, %cst_15 {dimension_numbers = #tpu.dot_dimension_numbers<[2], [0], [0, 1], [1], [0, 0, 0, 1, 1, 1], [], []>} : vector<2x16x16xf32>, vector<16x64xf32>, vector<2x16x64xf32> -> vector<2x16x64xf32>
    "tpu.trace_stop"() : () -> ()
    %c0_16 = arith.constant 0 : index
    %c0_17 = arith.constant 0 : index
    %18 = vector.load %arg7[%c0_16, %c0_17] : memref<1x64xf32, #tpu.memory_space<vmem>>, vector<1x64xf32>
    %19 = vector.shape_cast %18 : vector<1x64xf32> to vector<1x1x64xf32>
    %20 = vector.broadcast %19 : vector<1x1x64xf32> to vector<2x16x64xf32>
    %21 = arith.addf %17, %20 : vector<2x16x64xf32>
    %cst_18 = arith.constant 0.000000e+00 : f32
    %22 = vector.broadcast %cst_18 : f32 to vector<2x16x64xf32>
    %23 = arith.maximumf %21, %22 : vector<2x16x64xf32>
    %c0_19 = arith.constant 0 : index
    %c0_20 = arith.constant 0 : index
    %24 = vector.load %arg8[%c0_19, %c0_20] : memref<64x4xf32, #tpu.memory_space<vmem>>, vector<64x4xf32>
    "tpu.trace_start"() <{level = 10 : i32, message = "bnk,kh->bnh"}> : () -> ()
    %cst_21 = arith.constant dense<0.000000e+00> : vector<2x16x4xf32>
    %25 = tpu.matmul %23, %24, %cst_21 {dimension_numbers = #tpu.dot_dimension_numbers<[2], [0], [0, 1], [1], [0, 0, 0, 1, 1, 1], [], []>} : vector<2x16x64xf32>, vector<64x4xf32>, vector<2x16x4xf32> -> vector<2x16x4xf32>
    "tpu.trace_stop"() : () -> ()
    %c0_22 = arith.constant 0 : index
    %c0_23 = arith.constant 0 : index
    %26 = vector.load %arg9[%c0_22, %c0_23] : memref<1x4xf32, #tpu.memory_space<vmem>>, vector<1x4xf32>
    %27 = vector.shape_cast %26 : vector<1x4xf32> to vector<1x1x4xf32>
    %28 = vector.broadcast %27 : vector<1x1x4xf32> to vector<2x16x4xf32>
    %29 = arith.addf %25, %28 : vector<2x16x4xf32>
    %c0_24 = arith.constant 0 : index
    %c0_25 = arith.constant 0 : index
    %c0_26 = arith.constant 0 : index
    %30 = vector.load %arg10[%c0_24, %c0_25, %c0_26] : memref<2x16x4xf32, #tpu.memory_space<vmem>>, vector<2x16x4xf32>
    tpu.vector_store %arg10[%c0_24, %c0_25, %c0_26], %29 {strides = array<i32>} : memref<2x16x4xf32, #tpu.memory_space<vmem>>, vector<2x16x4xf32>,
    return
  }
  func.func @transform_0(%arg0: i32) -> (i32, i32, i32) {
    %c0_i32 = arith.constant 0 : i32
    %c0_i32_0 = arith.constant 0 : i32
    %c0_i32_1 = arith.constant 0 : i32
    return %arg0, %c0_i32, %c0_i32_0 : i32, i32, i32
  }
  func.func @transform_1(%arg0: i32) -> (i32, i32, i32) {
    %c0_i32 = arith.constant 0 : i32
    %c0_i32_0 = arith.constant 0 : i32
    %c0_i32_1 = arith.constant 0 : i32
    return %arg0, %c0_i32, %c0_i32_0 : i32, i32, i32
  }
  func.func @transform_2(%arg0: i32) -> (i32, i32) {
    %c0_i32 = arith.constant 0 : i32
    %c0_i32_0 = arith.constant 0 : i32
    %c0_i32_1 = arith.constant 0 : i32
    return %c0_i32, %c0_i32_0 : i32, i32
  }
  func.func @transform_3(%arg0: i32) -> (i32, i32) {
    %c0_i32 = arith.constant 0 : i32
    %c0_i32_0 = arith.constant 0 : i32
    %c0_i32_1 = arith.constant 0 : i32
    return %c0_i32, %c0_i32_0 : i32, i32
  }
  func.func @transform_4(%arg0: i32) -> (i32, i32) {
    %c0_i32 = arith.constant 0 : i32
    %c0_i32_0 = arith.constant 0 : i32
    %c0_i32_1 = arith.constant 0 : i32
    return %c0_i32, %c0_i32_0 : i32, i32
  }
  func.func @transform_5(%arg0: i32) -> (i32, i32) {
    %c0_i32 = arith.constant 0 : i32
    %c0_i32_0 = arith.constant 0 : i32
    %c0_i32_1 = arith.constant 0 : i32
    return %c0_i32, %c0_i32_0 : i32, i32
  }
  func.func @transform_6(%arg0: i32) -> (i32, i32) {
    %c0_i32 = arith.constant 0 : i32
    %c0_i32_0 = arith.constant 0 : i32
    %c0_i32_1 = arith.constant 0 : i32
    return %c0_i32, %c0_i32_0 : i32, i32
  }
  func.func @transform_7(%arg0: i32) -> (i32, i32) {
    %c0_i32 = arith.constant 0 : i32
    %c0_i32_0 = arith.constant 0 : i32
    %c0_i32_1 = arith.constant 0 : i32
    return %c0_i32, %c0_i32_0 : i32, i32
  }
  func.func @transform_8(%arg0: i32) -> (i32, i32) {
    %c0_i32 = arith.constant 0 : i32
    %c0_i32_0 = arith.constant 0 : i32
    %c0_i32_1 = arith.constant 0 : i32
    return %c0_i32, %c0_i32_0 : i32, i32
  }
  func.func @transform_9(%arg0: i32) -> (i32, i32, i32) {
    %c0_i32 = arith.constant 0 : i32
    %c0_i32_0 = arith.constant 0 : i32
    %c0_i32_1 = arith.constant 0 : i32
    return %arg0, %c0_i32, %c0_i32_0 : i32, i32, i32
  }
}

</mosaic_0001>

<bundles_post_ra>
// kernel: tpu_custom_call.1
= control target key start
LH: loop header
LB: loop body
LE: loop exit
PB: predicated region body
PF: predicated region fallthrough
CT: control target
= control target key end

     0   :  { %v327_v0 = vmov 0   ;;  %vm76_vm0 = vcmask 130048   ;;  %vm245_vm1 = vcmask 523264   ;;  %vm287_vm2 = vcmask 31744   ;;  %s474_s0 = inlined_call_operand.vmem [shape: f32[2,16,1], index: 0, kind: input, shape index: {}]   ;;  %s475_s2 = inlined_call_operand.vmem [shape: f32[1,16], index: 2, kind: input, shape index: {}]   ;;  %s476_s3 = inlined_call_operand.vmem [shape: f32[1,16], index: 3, kind: input, shape index: {}]   ;;  %s477_s4 = inlined_call_operand.vmem [shape: f32[16,16], index: 4, kind: input, shape index: {}]   ;;  %s478_s1 = inlined_call_operand.vmem [shape: f32[2,16,16], index: 1, kind: input, shape index: {}]   ;;  %s479_s6 = inlined_call_operand.vmem [shape: f32[1,64], index: 6, kind: input, shape index: {}]   ;;  %s480_s5 = inlined_call_operand.vmem [shape: f32[16,64], index: 5, kind: input, shape index: {}]   ;;  %s481_s7 = inlined_call_operand.vmem [shape: f32[64,4], index: 7, kind: input, shape index: {}]   ;;  %s482_s8 = inlined_call_operand.vmem [shape: f32[1,4], index: 8, kind: input, shape index: {}]   ;;  %s483_s9 = inlined_call_operand.vmem [shape: f32[2,16,4], index: 9, kind: output, shape index: {}]  }
   0x1   :  { %321 = vset.pattern.permute.xlu0 %v327_v0  ;;  %v33_v1 = vld [vmem:[%s474_s0 + $0x8] sm:$0xff]  ;;  %322 = vset.pattern.permute.xlu1 %v327_v0  ;;  %v35_v2 = vld [vmem:[%s474_s0 + $0x18] sm:$0xff]  ;;  %v32_v3 = vld [vmem:[%s474_s0] sm:$0xff] }
   0x2   :  { %45 = vperm.xlu0 %321, %v33_v1   ;;  %55 = vperm.xlu1 %322, %v35_v2   ;;  %v34_v4 = vld [vmem:[%s474_s0 + $0x10] sm:$0xff]  ;;  %v136_v5 = vld [vmem:[%s477_s4 + $0x8] sm:$0xff]  ;;  %v323_v6 = vld [vmem:[%s475_s2] ss:$0 sm:$0xff] }
   0x3   :  { %163 = vmatpush.msra.mxu2 %v136_v5  ;;  %v324_v7 = vld [vmem:[%s476_s3] ss:$0 sm:$0xff]  ;;  %v74_v21 = vld [vmem:[%s478_s1 + $0x10] sm:$0xff]  ;;  %v73_v22 = vld [vmem:[%s478_s1 + $0x8] sm:$0xff] }
   0x4   :  { %v72_v19 = vld [vmem:[%s478_s1] sm:$0xff]  ;;  %v75_v23 = vld [vmem:[%s478_s1 + $0x18] sm:$0xff]  ;;  %v183_v29 = vld [vmem:[%s480_s5 + $0x8] sm:$0xff] }
   0x5   :  { %v135_v24 = vld [vmem:[%s477_s4] sm:$0xff]  ;;  %214 = vmatpush.msra.mxu3 %v183_v29  ;;  %v240_v31 = vld [vmem:[%s481_s7 + $0x38] sm:$0xff]  ;;  %v239_v32 = vld [vmem:[%s481_s7 + $0x30] sm:$0xff] }
   0x6   :  { %164 = vmatpush.msra.mxu2 %v135_v24  ;;  %v182_v30 = vld [vmem:[%s480_s5] sm:$0xff]  ;;  %v238_v33 = vld [vmem:[%s481_s7 + $0x28] sm:$0xff]  ;;  %v236_v37 = vld [vmem:[%s481_s7 + $0x18] sm:$0xff] }
   0x7   :  { %215 = vmatpush.msra.mxu3 %v182_v30  ;;  %v237_v34 = vld [vmem:[%s481_s7 + $0x20] sm:$0xff]  ;;  %v235_v44 = vld [vmem:[%s481_s7 + $0x10] sm:$0xff]  ;;  %v234_v45 = vld [vmem:[%s481_s7 + $0x8] sm:$0xff] }
   0x8   :  { %v233_v46 = vld [vmem:[%s481_s7] sm:$0xff] }
   0x9   :  { %v325_v47 = vld [vmem:[%s479_s6] ss:$0 sm:$0xff] }
   0xa   :  { %40 = vperm.xlu0 %321, %v32_v3   ;;  %50 = vperm.xlu1 %322, %v34_v4   ;;  %v326_v60 = vld [vmem:[%s482_s8] ss:$0 sm:$0xff] }
  0x74   :  { %v46_v8 = vpop.permute.xlu0 %45  ;;  %v56_v9 = vpop.permute.xlu1 %55 }
  0x75   :  { %v62_v10 = vmul.f32 %v323_v6, %v46_v8  ;;  %v64_v11 = vmul.f32 %v323_v6, %v56_v9 }
  0x77   :  { %v69_v12 = vadd.f32 %v324_v7, %v62_v10  ;;  %v71_v13 = vadd.f32 %v324_v7, %v64_v11 }
  0x79   :  { %97 = vmatpush.msra.mxu0 %v69_v12  ;;  %126 = vmatpush.msra.mxu1 %v71_v13 }
  0x7c   :  { %v41_v14 = vpop.permute.xlu0 %40  ;;  %v51_v15 = vpop.permute.xlu1 %50 }
  0x7d   :  { %v61_v16 = vmul.f32 %v323_v6, %v41_v14  ;;  %v63_v17 = vmul.f32 %v323_v6, %v51_v15 }
  0x7f   :  { %v68_v18 = vadd.f32 %v324_v7, %v61_v16  ;;  %v70_v20 = vadd.f32 %v324_v7, %v63_v17 }
  0x81   :  { %98 = vmatpush.msra.mxu0 %v68_v18  ;;  %127 = vmatpush.msra.mxu1 %v70_v20 }
  0x82   :  { %296 = vmatmul.msk.f32.vlgmr.msra.gmra.mxu0 %vm76_vm0, %v72_v19  ;;  %298 = vmatmul.msk.f32.vlgmr.msra.gmra.mxu1 %vm76_vm0, %v74_v21 }
  0x83   :  { %266 = vmatpush.msrb.mxu0 %v240_v31  ;;  %312 = vmatpush.msrb.mxu1 %v240_v31 }
  0x85   :  { %267 = vmatpush.msrb.mxu0 %v239_v32  ;;  %313 = vmatpush.msrb.mxu1 %v239_v32 }
  0x87   :  { %268 = vmatpush.msrb.mxu0 %v238_v33  ;;  %314 = vmatpush.msrb.mxu1 %v238_v33 }
  0x89   :  { %269 = vmatpush.msrb.mxu0 %v237_v34  ;;  %315 = vmatpush.msrb.mxu1 %v237_v34 }
  0x8a   :  { %297 = vmatmul.msk.f32.gmra.mxu0 %vm76_vm0, %v73_v22  ;;  %299 = vmatmul.msk.f32.gmra.mxu1 %vm76_vm0, %v75_v23 }
  0x8b   :  { %270 = vmatpush.msrb.mxu0 %v236_v37  ;;  %316 = vmatpush.msrb.mxu1 %v236_v37 }
  0x8d   :  { %271 = vmatpush.msrb.mxu0 %v235_v44  ;;  %317 = vmatpush.msrb.mxu1 %v235_v44 }
  0x8f   :  { %272 = vmatpush.msrb.mxu0 %v234_v45  ;;  %318 = vmatpush.msrb.mxu1 %v234_v45 }
  0x91   :  { %273 = vmatpush.msrb.mxu0 %v233_v46  ;;  %319 = vmatpush.msrb.mxu1 %v233_v46 }
  0xff   :  { %v100_v25 = vpop.f32.mrf.mxu0  ;;  %v129_v27 = vpop.f32.mrf.mxu1 }
 0x100   :  { %300 = vmatmul.msk.f32.vlgmr.msra.gmra.mxu2 %vm76_vm0, %v100_v25 }
 0x107   :  { %v103_v26 = vpop.f32.mrf.mxu0  ;;  %v132_v28 = vpop.f32.mrf.mxu1 }
 0x108   :  { %301 = vmatmul.msk.f32.gmra.mxu2 %vm76_vm0, %v103_v26 }
 0x110   :  { %302 = vmatmul.msk.f32.gmra.mxu2 %vm76_vm0, %v129_v27 }
 0x118   :  { %303 = vmatmul.msk.f32.gmra.mxu2 %vm76_vm0, %v132_v28 }
 0x183   :  { %v166_v35 = vpop.f32.mrf.mxu2 }
 0x184   :  { %v178_v36 = vmax.f32 %v166_v35, 0.0 }
 0x186   :  { %304 = vmatmul.msk.f32.vlgmr.msra.gmra.mxu3 %vm76_vm0, %v178_v36 }
 0x18b   :  { %v169_v38 = vpop.f32.mrf.mxu2 }
 0x18c   :  { %v179_v39 = vmax.f32 %v169_v38, 0.0 }
 0x18e   :  { %305 = vmatmul.msk.f32.gmra.mxu3 %vm76_vm0, %v179_v39 }
 0x193   :  { %v172_v40 = vpop.f32.mrf.mxu2 }
 0x194   :  { %v180_v41 = vmax.f32 %v172_v40, 0.0 }
 0x196   :  { %306 = vmatmul.msk.f32.gmra.mxu3 %vm76_vm0, %v180_v41 }
 0x19b   :  { %v175_v42 = vpop.f32.mrf.mxu2 }
 0x19c   :  { %v181_v43 = vmax.f32 %v175_v42, 0.0 }
 0x19e   :  { %307 = vmatmul.msk.f32.gmra.mxu3 %vm76_vm0, %v181_v43 }
 0x209   :  { %v217_v48 = vpop.f32.mrf.mxu3 }
 0x20a   :  { %v218_v49 = vadd.f32 %v325_v47, %v217_v48 }
 0x20c   :  { %v229_v50 = vmax.f32 %v218_v49, 0.0 }
 0x20e   :  { %308 = vmatmul.msk.f32.vlgmr.msrb.gmra.mxu0 %vm245_vm1, %v229_v50 }
 0x211   :  { %v220_v51 = vpop.f32.mrf.mxu3 }
 0x212   :  { %v221_v52 = vadd.f32 %v325_v47, %v220_v51 }
 0x214   :  { %v230_v53 = vmax.f32 %v221_v52, 0.0 }
 0x216   :  { %309 = vmatmul.msk.f32.gmra.mxu0 %vm245_vm1, %v230_v53 }
 0x219   :  { %v223_v54 = vpop.f32.mrf.mxu3 }
 0x21a   :  { %v224_v55 = vadd.f32 %v325_v47, %v223_v54 }
 0x21c   :  { %v231_v56 = vmax.f32 %v224_v55, 0.0 }
 0x21e   :  { %310 = vmatmul.msk.f32.vlgmr.msrb.gmra.mxu1 %vm245_vm1, %v231_v56 }
 0x221   :  { %v226_v57 = vpop.f32.mrf.mxu3 }
 0x222   :  { %v227_v58 = vadd.f32 %v325_v47, %v226_v57 }
 0x224   :  { %v232_v59 = vmax.f32 %v227_v58, 0.0 }
 0x226   :  { %311 = vmatmul.msk.f32.gmra.mxu1 %vm245_vm1, %v232_v59 }
 0x28b   :  { %v275_v61 = vpop.f32.mrf.mxu0 }
 0x28c   :  { %v276_v62 = vadd.f32 %v326_v60, %v275_v61 }
 0x28e   :  { %288 = vst.msk [vmem:[%s483_s9] sm:$0xff] %vm287_vm2, %v276_v62 }
 0x293   :  { %v278_v63 = vpop.f32.mrf.mxu0 }
 0x294   :  { %v279_v0 = vadd.f32 %v326_v60, %v278_v63 }
 0x296   :  { %289 = vst.msk [vmem:[%s483_s9 + $0x8] sm:$0xff] %vm287_vm2, %v279_v0 }
 0x29b   :  { %v281_v1 = vpop.f32.mrf.mxu1 }
 0x29c   :  { %v282_v2 = vadd.f32 %v326_v60, %v281_v1 }
 0x29e   :  { %290 = vst.msk [vmem:[%s483_s9 + $0x10] sm:$0xff] %vm287_vm2, %v282_v2 }
 0x2a3   :  { %v284_v3 = vpop.f32.mrf.mxu1 }
 0x2a4   :  { %v285_v4 = vadd.f32 %v326_v60, %v284_v3 }
 0x2a6   :  { %291 = vst.msk [vmem:[%s483_s9 + $0x18] sm:$0xff] %vm287_vm2, %v285_v4 }

</bundles_post_ra>
